<compile_context>
chip_gen: v5e
topology: v5e:2x2
jax: 0.10.0
libtpu: 0.0.40
codegen_flags: <defaults>
</compile_context>

<pallas_src>
import functools

import jax
import jax.numpy as jnp
from jax import lax
from jax.experimental import pallas as pl
from jax.experimental.pallas import tpu as pltpu

_LANE = 128
_SUBLANE = 8
_MIN_TILE_HW = 512          # lane-tile floor when HW is large (>=2 KiB DMA rows)
_MIN_GRID_STEPS = 4         # >= 2x TensorCores on v7x for megacore balance
_MiB = 1024 * 1024


def _round_up(n, m):
    return ((n + m - 1) // m) * m


@functools.lru_cache(maxsize=1)
def _vmem_capacity_bytes() -> int:
    """Physical VMEM per TensorCore; conservative v7x fallback if probing fails."""
    try:
        cap = int(pltpu.get_tpu_info().vmem_capacity_bytes)
        if cap > 0:
            return cap
    except Exception:
        pass
    return 64 * _MiB


def _step_vmem_bytes(T, bb, C, tile_hw, in_itemsize):
    """Estimated on-chip bytes for one grid step, with layout padding,
    double-buffered I/O blocks, and in-kernel f32 temporaries (one T slab)."""
    sub_in = max(_SUBLANE, 32 // in_itemsize)       # 8 for f32, 16 for bf16
    c_in = _round_up(C, sub_in)
    c_f32 = _round_up(C, _SUBLANE)
    L = _round_up(tile_hw, _LANE)
    logits = 2 * T * bb * c_in * L * in_itemsize    # double-buffered input block
    temps = 4 * bb * c_f32 * L * 4                  # x_t upcast, exp, select, mask
    small = 6 * bb * _SUBLANE * L * 4               # tgt/out blocks (2x) + accums
    return logits + temps + small


def _aleatoric_kernel(x_ref, t_ref, out_ref, *, n_valid_hw, n_models):
    """One (batch-block, spatial-tile) step.

    x_ref:   (T, bb, C, L) logits (any float dtype; upcast per-T-slab to f32)
    t_ref:   (bb, 1, L) int32 targets
    out_ref: (bb, 1, L) f32 per-position log terms (0 past n_valid_hw)
    """
    _, bb, C, L = x_ref.shape
    tgt = t_ref[...]                                              # (bb, 1, L)

    # Class selector, hoisted out of the T loop (one compare total).
    cls = lax.broadcasted_iota(jnp.int32, (1, C, L), dimension=1)  # (1, C, L)
    sel = cls == tgt                                               # (bb, C, L) bool

    def body(t, sum_term):
        # Only one (bb, C, L) f32 slab of temporaries live per iteration.
        x_t = x_ref[t].astype(jnp.float32)                         # (bb, C, L)
        e = jnp.exp(x_t)                                           # matches torch ref (no max-sub)
        denom = jnp.sum(e, axis=1, keepdims=True) + 1e-8           # (bb, 1, L)
        e_tgt = jnp.sum(jnp.where(sel, e, 0.0), axis=1, keepdims=True)
        # exp(x_tgt - log(denom)) == e_tgt / denom  (exact division).
        return sum_term + e_tgt / denom

    init = jnp.zeros((bb, 1, L), jnp.float32)
    sum_term = lax.fori_loop(0, n_models, body, init,
                             unroll=bool(n_models <= 8))
    log_term = jnp.log(sum_term / n_models + 1e-8)                 # (bb, 1, L)

    # Tail mask: zero out spatial positions past the true H*W (edge tile).
    j = pl.program_id(1)
    pos = j * L + lax.broadcasted_iota(jnp.int32, (1, 1, L), dimension=2)
    out_ref[...] = jnp.where(pos < n_valid_hw, log_term, 0.0)


@jax.jit
def aleatoric_loss(inputs, target):
    """inputs: (T, B, C, H, W) or (B, C, H, W) float; target: (B, H, W) int."""
    if inputs.ndim == 4:
        inputs = inputs[None]
    T, B, C, H, W = inputs.shape
    HW = H * W
    super_B = B * HW

    # Free reshapes only -- no NCHW->NHWC transpose; spatial axis stays last
    # (lane-dense), class axis sits on sublanes.
    x = inputs.reshape(T, B, C, HW)
    tgt = target.reshape(B, 1, HW).astype(jnp.int32)
    in_itemsize = jnp.dtype(x.dtype).itemsize

    # --- VMEM budget (chip-aware, v7x-safe). ---
    vmem_cap = _vmem_capacity_bytes()
    vmem_limit = max(32 * _MiB, min(vmem_cap - 16 * _MiB, 96 * _MiB))
    step_budget = (vmem_limit * 3) // 4     # headroom for compiler scratch/spill

    # --- Lane-tile selection. ---
    if HW <= _MIN_TILE_HW:
        tile_hw = HW                        # full (possibly ragged) spatial dim
    else:
        per_lane = max(1, _step_vmem_bytes(T, 1, C, _LANE, in_itemsize) // _LANE)
        fit = max(_LANE, ((step_budget // per_lane) // _LANE) * _LANE)
        tile_hw = max(_MIN_TILE_HW, min((HW // _LANE) * _LANE, fit))
        # Megacore: keep enough parallel grid steps when B is tiny.
        max_tiles = pl.cdiv(HW, _MIN_TILE_HW)
        reachable = min(_MIN_GRID_STEPS, B * max_tiles)
        if B * pl.cdiv(HW, tile_hw) < reachable:
            want = pl.cdiv(reachable, B)
            alt = max(_MIN_TILE_HW, _round_up(pl.cdiv(HW, want), _LANE))
            while alt > _MIN_TILE_HW and B * pl.cdiv(HW, alt) < reachable:
                alt -= _LANE
            tile_hw = min(tile_hw, alt)
    num_hw_tiles = pl.cdiv(HW, tile_hw)

    # --- Batch folding: largest divisor of B that fits the budget while
    # keeping enough parallel grid steps (fires for any num_hw_tiles). ---
    target_min_steps = min(_MIN_GRID_STEPS, B * num_hw_tiles)
    bb = 1
    for d in range(1, B + 1):
        if B % d:
            continue
        if (B // d) * num_hw_tiles < target_min_steps:
            continue
        if _step_vmem_bytes(T, d, C, tile_hw, in_itemsize) > step_budget:
            continue
        bb = d
    grid = (B // bb, num_hw_tiles)

    kernel = functools.partial(_aleatoric_kernel, n_valid_hw=HW, n_models=T)
    log_terms = pl.pallas_call(
        kernel,
        out_shape=jax.ShapeDtypeStruct((B, 1, HW), jnp.float32),
        grid_spec=pltpu.PrefetchScalarGridSpec(
            num_scalar_prefetch=0,
            grid=grid,
            in_specs=[
                pl.BlockSpec((T, bb, C, tile_hw), lambda b, j: (0, b, 0, j)),
                pl.BlockSpec((bb, 1, tile_hw), lambda b, j: (b, 0, j)),
            ],
            out_specs=pl.BlockSpec((bb, 1, tile_hw), lambda b, j: (b, 0, j)),
        ),
        compiler_params=pltpu.CompilerParams(
            dimension_semantics=("parallel", "parallel"),
            vmem_limit_bytes=int(vmem_limit),
        ),
    )(x, tgt)

    # Final reduction + normalization (tiny: N floats vs the N*T*C read above).
    return -jnp.sum(log_terms) / super_B


def _reference(inputs, target):
    """Pure-JAX reference mirroring the torch forward exactly."""
    if inputs.ndim == 4:
        inputs = inputs[None]
    T, B, C, H, W = inputs.shape
    super_B = B * H * W
    x = jnp.transpose(inputs, (0, 1, 3, 4, 2)).reshape(T, super_B, C)
    tgt = target.reshape(super_B)
    idx = x[:, jnp.arange(super_B), tgt]                                  # (T, N)
    denom = jnp.log(jnp.sum(jnp.exp(x), axis=-1) + 1e-8)                  # (T, N)
    sum_term = jnp.sum(jnp.exp(idx - denom), axis=0)                      # (N,)
    log_term = jnp.log(sum_term / T + 1e-8)
    return -jnp.sum(log_term) / super_B


if __name__ == "__main__":
    key = jax.random.PRNGKey(0)
    k1, k2, k3, k4, k5, k6 = jax.random.split(key, 6)

    # Case 1: (T, B, C, H, W) with H*W a multiple of 128.
    T, B, C, H, W = 2, 2, 4, 16, 16
    inputs = jax.random.normal(k1, (T, B, C, H, W), dtype=jnp.float32)
    target = jax.random.randint(k2, (B, H, W), 0, C, dtype=jnp.int32)
    loss = aleatoric_loss(inputs, target)
    jax.block_until_ready(loss)
    ref = _reference(inputs, target)
    assert jnp.allclose(loss, ref, rtol=1e-5, atol=1e-5), (loss, ref)

    # Case 2: 4-D input (T==1 path) with small ragged H*W (full-tile path).
    B2, C2, H2, W2 = 2, 4, 12, 20          # H*W = 240 < 512
    inputs2 = jax.random.normal(k3, (B2, C2, H2, W2), dtype=jnp.float32)
    target2 = jax.random.randint(k4, (B2, H2, W2), 0, C2, dtype=jnp.int32)
    loss2 = aleatoric_loss(inputs2, target2)
    jax.block_until_ready(loss2)
    ref2 = _reference(inputs2, target2)
    assert jnp.allclose(loss2, ref2, rtol=1e-5, atol=1e-5), (loss2, ref2)

    # Case 3: H*W > 512 and not a multiple of the lane tile (exercises the
    # multi-tile grid + tail masking), with C not a multiple of 8.
    T3, B3, C3, H3, W3 = 2, 2, 3, 20, 33   # H*W = 660 -> tiles of 512 + ragged tail
    inputs3 = jax.random.normal(k5, (T3, B3, C3, H3, W3), dtype=jnp.float32)
    target3 = jax.random.randint(k6, (B3, H3, W3), 0, C3, dtype=jnp.int32)
    loss3 = aleatoric_loss(inputs3, target3)
    jax.block_until_ready(loss3)
    ref3 = _reference(inputs3, target3)
    assert jnp.allclose(loss3, ref3, rtol=1e-5, atol=1e-5), (loss3, ref3)

    # NOTE: reduction='mean'-equivalent behavior; ignore_index / class weight
    # are unused in the reference forward, so they are not modeled here.
    print("KERNEL_OK")
</pallas_src>

<mosaic_0001>
module attributes {stable_mosaic.version = 11 : i64} {
  func.func @_aleatoric_kernel(%arg0: i32, %arg1: i32, %arg2: memref<2x1x4x256xf32, #tpu.memory_space<vmem>>, %arg3: memref<1x1x256xi32, #tpu.memory_space<vmem>>, %arg4: memref<1x1x256xf32, #tpu.memory_space<vmem>>) attributes {dimension_semantics = [#tpu.dimension_semantics<parallel>, #tpu.dimension_semantics<parallel>], iteration_bounds = array<i64: 2, 1>, scalar_prefetch = 0 : i64, scratch_operands = 0 : i64, tpu.core_type = #tpu.core_type<tc>, window_params = [{transform_indices = @transform_0, window_bounds = array<i64: 2, 1, 4, 256>}, {transform_indices = @transform_1, window_bounds = array<i64: 1, 1, 256>}, {transform_indices = @transform_2, window_bounds = array<i64: 1, 1, 256>}]} {
    %c0 = arith.constant 0 : index
    %c0_0 = arith.constant 0 : index
    %c0_1 = arith.constant 0 : index
    %0 = vector.load %arg3[%c0, %c0_0, %c0_1] : memref<1x1x256xi32, #tpu.memory_space<vmem>>, vector<1x1x256xi32>
    %1 = tpu.iota {dimensions = array<i32: 1>} : vector<1x4x256xi32>
    %2 = vector.broadcast %0 : vector<1x1x256xi32> to vector<1x4x256xi32>
    %3 = arith.cmpi eq, %1, %2 : vector<1x4x256xi32>
    %cst = arith.constant 0.000000e+00 : f32
    %4 = vector.broadcast %cst : f32 to vector<1x1x256xf32>
    %c0_i32 = arith.constant 0 : i32
    %5 = arith.index_cast %c0_i32 : i32 to index
    %c0_2 = arith.constant 0 : index
    %c0_3 = arith.constant 0 : index
    %c0_4 = arith.constant 0 : index
    %6 = vector.load %arg2[%5, %c0_2, %c0_3, %c0_4] : memref<2x1x4x256xf32, #tpu.memory_space<vmem>>, vector<1x1x4x256xf32>
    %7 = vector.shape_cast %6 : vector<1x1x4x256xf32> to vector<1x4x256xf32>
    %8 = math.exp %7 : vector<1x4x256xf32>
    %cst_5 = arith.constant dense<0.000000e+00> : vector<1x256xf32>
    %9 = vector.multi_reduction <add>, %8, %cst_5 [1] : vector<1x4x256xf32> to vector<1x256xf32>
    %10 = vector.shape_cast %9 : vector<1x256xf32> to vector<1x1x256xf32>
    %cst_6 = arith.constant 9.99999993E-9 : f32
    %11 = vector.broadcast %cst_6 : f32 to vector<1x1x256xf32>
    %12 = arith.addf %10, %11 : vector<1x1x256xf32>
    %cst_7 = arith.constant 0.000000e+00 : f32
    %13 = vector.broadcast %cst_7 : f32 to vector<1x4x256xf32>
    %14 = arith.select %3, %8, %13 : vector<1x4x256xi1>, vector<1x4x256xf32>
    %cst_8 = arith.constant dense<0.000000e+00> : vector<1x256xf32>
    %15 = vector.multi_reduction <add>, %14, %cst_8 [1] : vector<1x4x256xf32> to vector<1x256xf32>
    %16 = vector.shape_cast %15 : vector<1x256xf32> to vector<1x1x256xf32>
    %17 = arith.divf %16, %12 : vector<1x1x256xf32>
    %18 = arith.addf %4, %17 : vector<1x1x256xf32>
    %c1_i32 = arith.constant 1 : i32
    %19 = arith.index_cast %c1_i32 : i32 to index
    %c0_9 = arith.constant 0 : index
    %c0_10 = arith.constant 0 : index
    %c0_11 = arith.constant 0 : index
    %20 = vector.load %arg2[%19, %c0_9, %c0_10, %c0_11] : memref<2x1x4x256xf32, #tpu.memory_space<vmem>>, vector<1x1x4x256xf32>
    %21 = vector.shape_cast %20 : vector<1x1x4x256xf32> to vector<1x4x256xf32>
    %22 = math.exp %21 : vector<1x4x256xf32>
    %cst_12 = arith.constant dense<0.000000e+00> : vector<1x256xf32>
    %23 = vector.multi_reduction <add>, %22, %cst_12 [1] : vector<1x4x256xf32> to vector<1x256xf32>
    %24 = vector.shape_cast %23 : vector<1x256xf32> to vector<1x1x256xf32>
    %cst_13 = arith.constant 9.99999993E-9 : f32
    %25 = vector.broadcast %cst_13 : f32 to vector<1x1x256xf32>
    %26 = arith.addf %24, %25 : vector<1x1x256xf32>
    %cst_14 = arith.constant 0.000000e+00 : f32
    %27 = vector.broadcast %cst_14 : f32 to vector<1x4x256xf32>
    %28 = arith.select %3, %22, %27 : vector<1x4x256xi1>, vector<1x4x256xf32>
    %cst_15 = arith.constant dense<0.000000e+00> : vector<1x256xf32>
    %29 = vector.multi_reduction <add>, %28, %cst_15 [1] : vector<1x4x256xf32> to vector<1x256xf32>
    %30 = vector.shape_cast %29 : vector<1x256xf32> to vector<1x1x256xf32>
    %31 = arith.divf %30, %26 : vector<1x1x256xf32>
    %32 = arith.addf %18, %31 : vector<1x1x256xf32>
    %c2_i32 = arith.constant 2 : i32
    %cst_16 = arith.constant 2.000000e+00 : f32
    %33 = vector.broadcast %cst_16 : f32 to vector<1x1x256xf32>
    %34 = arith.divf %32, %33 : vector<1x1x256xf32>
    %cst_17 = arith.constant 9.99999993E-9 : f32
    %35 = vector.broadcast %cst_17 : f32 to vector<1x1x256xf32>
    %36 = arith.addf %34, %35 : vector<1x1x256xf32>
    %37 = math.log %36 : vector<1x1x256xf32>
    %c256_i32 = arith.constant 256 : i32
    %38 = arith.muli %arg1, %c256_i32 : i32
    %39 = tpu.iota {dimensions = array<i32: 2>} : vector<1x1x256xi32>
    %40 = vector.broadcast %38 : i32 to vector<1x1x256xi32>
    %41 = arith.addi %40, %39 : vector<1x1x256xi32>
    %c256_i32_18 = arith.constant 256 : i32
    %42 = vector.broadcast %c256_i32_18 : i32 to vector<1x1x256xi32>
    %43 = arith.cmpi slt, %41, %42 : vector<1x1x256xi32>
    %cst_19 = arith.constant 0.000000e+00 : f32
    %44 = vector.broadcast %cst_19 : f32 to vector<1x1x256xf32>
    %45 = arith.select %43, %37, %44 : vector<1x1x256xi1>, vector<1x1x256xf32>
    %c0_20 = arith.constant 0 : index
    %c0_21 = arith.constant 0 : index
    %c0_22 = arith.constant 0 : index
    %46 = vector.load %arg4[%c0_20, %c0_21, %c0_22] : memref<1x1x256xf32, #tpu.memory_space<vmem>>, vector<1x1x256xf32>
    tpu.vector_store %arg4[%c0_20, %c0_21, %c0_22], %45 {strides = array<i32>} : memref<1x1x256xf32, #tpu.memory_space<vmem>>, vector<1x1x256xf32>,
    return
  }
  func.func @transform_0(%arg0: i32, %arg1: i32) -> (i32, i32, i32, i32) {
    %c0_i32 = arith.constant 0 : i32
    %c0_i32_0 = arith.constant 0 : i32
    %c0_i32_1 = arith.constant 0 : i32
    return %c0_i32, %arg0, %c0_i32_0, %arg1 : i32, i32, i32, i32
  }
  func.func @transform_1(%arg0: i32, %arg1: i32) -> (i32, i32, i32) {
    %c0_i32 = arith.constant 0 : i32
    %c0_i32_0 = arith.constant 0 : i32
    return %arg0, %c0_i32, %arg1 : i32, i32, i32
  }
  func.func @transform_2(%arg0: i32, %arg1: i32) -> (i32, i32, i32) {
    %c0_i32 = arith.constant 0 : i32
    %c0_i32_0 = arith.constant 0 : i32
    return %arg0, %c0_i32, %arg1 : i32, i32, i32
  }
}

</mosaic_0001>

<bundles_post_ra>
// kernel: aleatoric_loss.1
= control target key start
LH: loop header
LB: loop body
LE: loop exit
PB: predicated region body
PF: predicated region fallthrough
CT: control target
= control target key end

     0   :  { %s674_s9 = smov 0   ;;  %s676_s10 = smov 0   ;;  %s855_s0 = inlined_call_operand.vmem [shape: f32[2,2,4,256], index: 0, kind: input, shape index: {}]   ;;  %s856_s1 = inlined_call_operand.vmem [shape: s32[2,1,256], index: 1, kind: input, shape index: {}]   ;;  %s857_s2 = inlined_call_operand.vmem [shape: f32[2,1,256], index: 2, kind: output, shape index: {}]  }
   0x1   :  { %s678_s11 = smov 0   ;;  %s680_s12 = smov 0  }
   0x2   :  { %s682_s13 = smov 0  }
   0x3 LB: > { %s24_s14 = sadd.s32 1, %s652_s12  ;;  %p40_p1 = scmp.ne.s32.totalorder %s644_s10, %s640_s9  ;;  %s656_s13 = sphi %s682_s13, %s12_s13   ;;  %s652_s12 = sphi %s680_s12, %s873_s12   ;;  %s648_s11 = sphi %s678_s11, %s872_s11   ;;  %s644_s10 = sphi %s676_s10, %s871_s10   ;;  %s640_s9 = sphi %s674_s9, %s870_s9  }
   0x4   : > { %p26_p0 = scmp.ge.s32.totalorder %s24_s14, 2  ;;  %p41_p2 = scmp.eq.s32.totalorder %s656_s13, 0 }
   0x5   : > { %s33_s16 = sadd.s32 1, %s644_s10  ;;  %p547_p5 = scmp.ge.s32.totalorder %s656_s13, 2 }
   0x6   : > { %s875_s14 = smov (%p26_p0, %s24_s14), 0  ;;  %p42_p3 = por %p41_p2, %p40_p1 }
   0x7   : > { %s28_s15 = ssub.s32 %s652_s12, %s875_s14  ;;  %122 = sbr.rel (%p547_p5) target bundleno = 18 (0x12), region = 16 }
   0x8   : > { %p31_p4 = scmp.eq.s32.totalorder %s28_s15, 0 }
   0xa   : > { %s709_s17 = scalar_select %p31_p4, %s644_s10, %s33_s16  }
   0xc   : > { %125 = sbr.rel (!%p42_p3) target bundleno = 18 (0x12), region = 20  ;;  %s127_s18 = sand.u32 (%p42_p3), 1, %s644_s10  }
   0xd   : > { %s558_s19 = sshll.u32 (%p42_p3), %s652_s12, 3  ;;  %s548_s20 = sshll.u32 (%p42_p3), %s127_s18, 4 }
   0xe   : > { %s134_s23 = scalar_lea.vmem (%p42_p3), %s855_s0, %s558_s19  ;;  %s129_s24 = scalar_lea.vmem (%p42_p3), [#allocation2], %s548_s20 }
   0xf   : > { %v165_v0 = vld [vmem:[%s134_s23] sm:$0xff] (%p42_p3)  ;;  %v167_v1 = vld [vmem:[%s134_s23 + $0x10] sm:$0xff] (%p42_p3) }
  0x10   : > { %166 = vst [vmem:[%s129_s24] sm:$0xff] (%p42_p3), %v165_v0 }
  0x11   : > { %168 = vst [vmem:[%s129_s24 + $0x8] sm:$0xff] %v167_v1 }
  0x12 PF: > { %p551_p6 = scmp.ge.s32.totalorder %s656_s13, 1  ;;  %p185_p7 = scmp.lt.s32.totalorder %s656_s13, 3 }
  0x14   : > { %p186_p8 = pnand %p551_p6, %p185_p7 }
  0x15   : > { %s192_s25 = sand.u32 (!%p186_p8), 1, %s640_s9   ;;  %p226_p9 = scmp.lt.s32.totalorder (!%p186_p8), %s648_s11, 1 }
  0x16   : > { %189 = sbr.rel (%p186_p8) target bundleno = 115 (0x73), region = 62  ;;  %s552_s26 = sshll.u32 (!%p186_p8), %s192_s25, 4 }
  0x17   : > { %s194_s27 = scalar_lea.vmem (!%p186_p8), [#allocation2], %s552_s26 }
  0x1b   : > { %v250_v2 = vld [vmem:[%s194_s27] sm:$0xff]  ;;  %s877_s11 = smov (!%p226_p9, %s648_s11), 1  ;;  %v555_v5 = vld [vmem:[%s194_s27 + $0x8] sm:$0xff]  ;;  %vm259_vm0 = vcmask 1043456   ;;  %v244_v9 = vlaneseq  ;;  %v658_v59 = vmov 2.0  }
  0x1c   : > { %v251_v3 = vmul.f32 1.442695, %v250_v2  ;;  %s553_s28 = sshll.u32 %s877_s11, 1  ;;  %v331_v6 = vmul.f32 1.442695, %v555_v5 }
  0x1d   : > { %s232_s3 = scalar_lea.vmem %s856_s1, %s553_s28  ;;  %v245_v17 = vshrl.u32 %v244_v9, 7  ;;  %s241_s6 = scalar_lea.vmem %s857_s2, %s553_s28 }
  0x1e   : > { %600 = vpow2.f32 %v251_v3  ;;  %v243_v12 = vld [vmem:[%s232_s3] sm:$0x3] }
  0x1f   : > { %602 = vpow2.f32 %v331_v6  ;;  %v246_v18 = vperm.slane %v243_v12, 0  ;;  %v247_v19 = vperm.slane %v243_v12, 1 }
  0x21   : > { %vm733_vm1 = vcmp.eq.s32.totalorder %v245_v17, %v246_v18  ;;  %vm737_vm2 = vcmp.eq.s32.totalorder %v245_v17, %v247_v19 }
  0x24   : > { %v601_v4 = vpop.eup %600 }
  0x25   : > { %254 = vst [vmem:[#allocation1] ss:$2 sm:$0xff] %v601_v4  ;;  %v603_v20 = vpop.eup %602 }
  0x2c   : > { %v255_v7 = vld.sshfl [vmem:[#allocation1] sm:$0xff pattern:$0x75316420]  ;;  %v256_v8 = vld.sshfl [vmem:[#allocation1 + $0x8] sm:$0xff pattern:$0x75316420] }
  0x2d   : > { %v260_v10 = vsel %vm259_vm0, %v255_v7, 0.0  ;;  %v267_v11 = vsel %vm259_vm0, %v256_v8, 0.0  ;;  %276 = vst [vmem:[#allocation1] ss:$2 sm:$0xff] %v601_v4 }
  0x2e   : > { %v261_v13 = vrot.slane %v260_v10, 4  ;;  %v268_v14 = vrot.slane %v267_v11, 4 }
  0x30   : > { %v262_v15 = vadd.f32 %v261_v13, %v260_v10  ;;  %v269_v16 = vadd.f32 %v268_v14, %v267_v11 }
  0x32   : > { %v263_v21 = vrot.slane %v262_v15, 2  ;;  %v270_v22 = vrot.slane %v269_v16, 2 }
  0x34   : > { %v264_v23 = vadd.f32 %v263_v21, %v262_v15  ;;  %v271_v24 = vadd.f32 %v270_v22, %v269_v16  ;;  %v277_v25 = vld.sshfl [vmem:[#allocation1] sm:$0xff pattern:$0x75316420]  ;;  %v278_v26 = vld.sshfl [vmem:[#allocation1 + $0x8] sm:$0xff pattern:$0x75316420] }
  0x35   : > { %334 = vst [vmem:[#allocation1] ss:$2 sm:$0xff] %v603_v20  ;;  %v281_v31 = vsel %vm733_vm1, %v277_v25, 0.0  ;;  %v282_v34 = vsel %vm737_vm2, %v278_v26, 0.0 }
  0x36   : > { %v265_v29 = vrot.slane %v264_v23, 1  ;;  %v272_v30 = vrot.slane %v271_v24, 1  ;;  %v283_v37 = vsel %vm259_vm0, %v281_v31, 0.0  ;;  %v290_v38 = vsel %vm259_vm0, %v282_v34, 0.0 }
  0x37   : > { %v284_v43 = vrot.slane %v283_v37, 4  ;;  %v291_v48 = vrot.slane %v290_v38, 4 }
  0x38   : > { %v266_v32 = vadd.f32 %v265_v29, %v264_v23  ;;  %v273_v33 = vadd.f32 %v272_v30, %v271_v24 }
  0x39   : > { %v285_v49 = vadd.f32 %v284_v43, %v283_v37  ;;  %v292_v56 = vadd.f32 %v291_v48, %v290_v38 }
  0x3a   : > { %v745_v35 = vadd.f32 1e-08, %v266_v32  ;;  %v747_v36 = vadd.f32 1e-08, %v273_v33 }
  0x3b   : > { %v286_v60 = vrot.slane %v285_v49, 2  ;;  %v293_v8 = vrot.slane %v292_v56, 2 }
  0x3c   : > { %604 = vrcp.f32 %v745_v35  ;;  %v335_v39 = vld.sshfl [vmem:[#allocation1] sm:$0xff pattern:$0x75316420]  ;;  %v336_v40 = vld.sshfl [vmem:[#allocation1 + $0x8] sm:$0xff pattern:$0x75316420]  ;;  %vm302_vm3 = vweird.f32 %v745_v35  ;;  %vm317_vm5 = vweird.f32 %v747_v36 }
  0x3d   : > { %606 = vrcp.f32 %v747_v36  ;;  %v339_v41 = vsel %vm259_vm0, %v335_v39, 0.0  ;;  %v346_v42 = vsel %vm259_vm0, %v336_v40, 0.0  ;;  %355 = vst [vmem:[#allocation1] ss:$2 sm:$0xff] %v603_v20  ;;  %v287_v15 = vadd.f32 %v286_v60, %v285_v49 }
  0x3e   : > { %v340_v44 = vrot.slane %v339_v41, 4  ;;  %v347_v45 = vrot.slane %v346_v42, 4  ;;  %608 = vrcp.f32 %v658_v59  ;;  %v294_v18 = vadd.f32 %v293_v8, %v292_v56 }
  0x3f   : > { %v288_v22 = vrot.slane %v287_v15, 1  ;;  %v306_v23 = vand.u32 2147483647, %v745_v35  ;;  %v308_v25 = vand.u32 2147483648, %v745_v35  ;;  %v321_v26 = vand.u32 2147483647, %v747_v36 }
  0x40   : > { %v341_v46 = vadd.f32 %v340_v44, %v339_v41  ;;  %v348_v47 = vadd.f32 %v347_v45, %v346_v42  ;;  %v295_v28 = vrot.slane %v294_v18, 1  ;;  %v323_v29 = vand.u32 2147483648, %v747_v36 }
  0x41   : > { %v289_v34 = vadd.f32 %v288_v22, %v287_v15  ;;  %vm788_vm6 = vcmp.eq.f32.partialorder %v306_v23, 8.507059e+37  ;;  %v309_v40 = vor.u32 1.1754944e-38, %v308_v25  ;;  %vm794_vm8 = vcmp.eq.f32.partialorder %v321_v26, 8.507059e+37 }
  0x42   : > { %v755_v50 = vpop.eup %604  ;;  %v342_v51 = vrot.slane %v341_v46, 2  ;;  %v349_v52 = vrot.slane %v348_v47, 2  ;;  %v296_v44 = vadd.f32 %v295_v28, %v294_v18 }
  0x43   : > { %v757_v53 = vpop.eup %606  ;;  %v298_v61 = vmul.f32 %v755_v50, %v745_v35  ;;  %vm303_vm4 = vweird.f32 %v755_v50 }
  0x44   : > { %v343_v54 = vadd.f32 %v342_v51, %v341_v46  ;;  %v350_v55 = vadd.f32 %v349_v52, %v348_v47  ;;  %v356_v57 = vld.sshfl [vmem:[#allocation1] sm:$0xff pattern:$0x75316420]  ;;  %v357_v58 = vld.sshfl [vmem:[#allocation1 + $0x8] sm:$0xff pattern:$0x75316420]  ;;  %v313_v0 = vmul.f32 %v757_v53, %v747_v36  ;;  %v769_v12 = vpop.eup %608  ;;  %vm318_vm7 = vweird.f32 %v757_v53  ;;  %vm801_vm9 = vmor %vm302_vm3, %vm303_vm4 }
  0x45   : > { %v360_v62 = vsel %vm733_vm1, %v356_v57, 0.0  ;;  %v361_v63 = vsel %vm737_vm2, %v357_v58, 0.0  ;;  %v299_v11 = vsub.f32 1.0, %v298_v61  ;;  %v409_v21 = vmul.f32 2.0, %v769_v12  ;;  %vm811_vm10 = vmor %vm317_vm5, %vm318_vm7 }
  0x46   : > { %v344_v1 = vrot.slane %v343_v54, 1  ;;  %v351_v2 = vrot.slane %v350_v55, 1  ;;  %v362_v3 = vsel %vm259_vm0, %v360_v62, 0.0  ;;  %v369_v5 = vsel %vm259_vm0, %v361_v63, 0.0 }
  0x47   : > { %v363_v4 = vrot.slane %v362_v3, 4  ;;  %v370_v10 = vrot.slane %v369_v5, 4  ;;  %v314_v16 = vsub.f32 1.0, %v313_v0  ;;  %v300_v20 = vmul.f32 %v755_v50, %v299_v11 }
  0x48   : > { %v345_v6 = vadd.f32 %v344_v1, %v343_v54  ;;  %v352_v7 = vadd.f32 %v351_v2, %v350_v55  ;;  %v410_v32 = vsub.f32 1.0, %v409_v21  ;;  %v324_v46 = vor.u32 1.1754944e-38, %v323_v29 }
  0x49   : > { %v364_v17 = vadd.f32 %v363_v4, %v362_v3  ;;  %v371_v19 = vadd.f32 %v370_v10, %v369_v5  ;;  %v315_v24 = vmul.f32 %v757_v53, %v314_v16  ;;  %v301_v31 = vadd.f32 %v755_v50, %v300_v20 }
  0x4a   : > { %v771_v13 = vadd.f32 1e-08, %v345_v6  ;;  %v773_v14 = vadd.f32 1e-08, %v352_v7  ;;  %v411_v35 = vmul.f32 %v769_v12, %v410_v32  ;;  %vm413_vm11 = vweird.f32 %v769_v12 }
  0x4b   : > { %v365_v27 = vrot.slane %v364_v17, 2  ;;  %v372_v30 = vrot.slane %v371_v19, 2  ;;  %v316_v38 = vadd.f32 %v757_v53, %v315_v24  ;;  %v305_v49 = vsel %vm801_vm9, %v755_v50, %v301_v31 }
  0x4c   : > { %610 = vrcp.f32 %v771_v13  ;;  %v385_v55 = vand.u32 2147483647, %v771_v13  ;;  %v387_v56 = vand.u32 2147483648, %v771_v13  ;;  %v402_v58 = vand.u32 2147483648, %v773_v14 }
  0x4d   : > { %612 = vrcp.f32 %v773_v14  ;;  %v366_v42 = vadd.f32 %v365_v27, %v364_v17  ;;  %v373_v47 = vadd.f32 %v372_v30, %v371_v19  ;;  %v320_v54 = vsel %vm811_vm10, %v757_v53, %v316_v38 }
  0x4e   : > { %v400_v61 = vand.u32 2147483647, %v773_v14  ;;  %v310_v62 = vsel %vm788_vm6, %v309_v40, %v305_v49  ;;  %vm381_vm14 = vweird.f32 %v771_v13  ;;  %v412_v53 = vadd.f32 %v769_v12, %v411_v35 }
  0x4f   : > { %v367_v57 = vrot.slane %v366_v42, 1  ;;  %v374_v59 = vrot.slane %v373_v47, 1  ;;  %v325_v0 = vsel %vm794_vm8, %v324_v46, %v320_v54  ;;  %v388_v1 = vor.u32 1.1754944e-38, %v387_v56 }
  0x50   : > { %vm396_vm0 = vweird.f32 %v773_v14  ;;  %vm386_vm1 = vcmp.eq.f32.partialorder %v385_v55, 8.507059e+37  ;;  %v403_v5 = vor.u32 1.1754944e-38, %v402_v58  ;;  %vm401_vm3 = vcmp.eq.f32.partialorder %v400_v61, 8.507059e+37 }
  0x51   : > { %v368_v3 = vadd.f32 %v367_v57, %v366_v42  ;;  %v375_v6 = vadd.f32 %v374_v59, %v373_v47  ;;  %v311_v10 = vmul.f32 %v310_v62, %v289_v34  ;;  %v326_v15 = vmul.f32 %v325_v0, %v296_v44 }
  0x52   : > { %v611_v33 = vpop.eup %610  ;;  %v414_v17 = vsel %vm413_vm11, %v769_v12, %v412_v53  ;;  %vm437_vm4 = vcmask 1040384   ;;  %vm442_vm5 = vcmp.lt.s32.totalorder %v244_v9, 256 }
  0x53   : > { %v613_v39 = vpop.eup %612  ;;  %v377_v43 = vmul.f32 %v611_v33, %v771_v13  ;;  %vm382_vm12 = vweird.f32 %v611_v33 }
  0x54   : > { %v392_v48 = vmul.f32 %v613_v39, %v773_v14  ;;  %vm397_vm13 = vweird.f32 %v613_v39  ;;  %vm383_vm15 = vmor %vm381_vm14, %vm382_vm12 }
  0x55   : > { %v378_v52 = vsub.f32 1.0, %v377_v43  ;;  %vm398_vm2 = vmor %vm396_vm0, %vm397_vm13 }
  0x56   : > { %v393_v50 = vsub.f32 1.0, %v392_v48 }
  0x57   : > { %v379_v36 = vmul.f32 %v611_v33, %v378_v52 }
  0x58   : > { %v394_v60 = vmul.f32 %v613_v39, %v393_v50 }
  0x59   : > { %v380_v63 = vadd.f32 %v611_v33, %v379_v36 }
  0x5a   : > { %v395_v2 = vadd.f32 %v613_v39, %v394_v60 }
  0x5b   : > { %v384_v4 = vsel %vm383_vm15, %v611_v33, %v380_v63 }
  0x5c   : > { %v389_v7 = vsel %vm386_vm1, %v388_v1, %v384_v4  ;;  %v399_v8 = vsel %vm398_vm2, %v613_v39, %v395_v2 }
  0x5d   : > { %v390_v11 = vmul.f32 %v389_v7, %v368_v3  ;;  %v404_v13 = vsel %vm401_vm3, %v403_v5, %v399_v8 }
  0x5e   : > { %v405_v16 = vmul.f32 %v404_v13, %v375_v6 }
  0x5f   : > { %v406_v14 = vadd.f32 %v390_v11, %v311_v10 }
  0x60   : > { %v407_v18 = vadd.f32 %v405_v16, %v326_v15 }
  0x61   : > { %v415_v19 = vmul.f32 %v414_v17, %v406_v14 }
  0x62   : > { %v416_v20 = vmul.f32 %v414_v17, %v407_v18 }
  0x63   : > { %v417_v21 = vadd.f32 1e-08, %v415_v19 }
  0x64   : > { %v418_v22 = vadd.f32 1e-08, %v416_v20 }
  0x65   : > { %614 = vlog2.f32 %v417_v21 }
  0x66   : > { %616 = vlog2.f32 %v418_v22 }
  0x6b   : > { %v615_v23 = vpop.eup %614 }
  0x6c   : > { %v617_v24 = vpop.eup %616  ;;  %v420_v26 = vmul.f32 0.6931472, %v615_v23 }
  0x6d   : > { %v422_v25 = vmul.f32 0.6931472, %v617_v24 }
  0x6f   : > { %v436_v27 = vrot.slane %v422_v25, 7 }
  0x71   : > { %v438_v12 = vsel %vm437_vm4, %v420_v26, %v436_v27 }
  0x72   : > { %444 = vst.msk [vmem:[%s241_s6] sm:$0x3] %vm442_vm5, %v438_v12 }
  0x73 PF: > { %s12_s13 = sadd.s32 1, %s656_s13   ;;  %s870_s9 = smov %s644_s10 }
  0x74   : > { %p9_p10 = scmp.ge.s32.totalorder %s12_s13, 4   ;;  %s871_s10 = smov %s709_s17 }
  0x75   : > { %s872_s11 = smov %s652_s12  ;;  %s873_s12 = smov %s875_s14 }
  0x76   :  { %11 = sbr.rel (!%p9_p10) target bundleno = 3 (0x3), region = 105 }

</bundles_post_ra>
